<compile_context>
chip_gen: v6e
topology: v6e:2x2x1
jax: 0.10.0
libtpu: 0.0.40
codegen_flags: <defaults>
</compile_context>

<pallas_src>
import functools

import jax
import jax.numpy as jnp
import numpy as np
from jax.experimental import pallas as pl
from jax.experimental.pallas import tpu as pltpu


# --------------------------------------------------------------------------- #
# Kernel
# --------------------------------------------------------------------------- #
def _quantization_kernel(x_ref, sel_ref, out_ref, *, B):
    x = x_ref[...]                                        # (tb, nf) f32
    step = jnp.float32(2 ** B)

    # torch.round rounds half-to-even; jnp.round matches. q is integer-valued f32.
    q = jnp.round(x * step - jnp.float32(0.5))

    # uint8 wrap in f32 *before* the lane expansion:
    #   for integer-valued q with |q| < 2**24,  q - 256*floor(q/256) == int(q) & 0xFF.
    # Keeps the MXU inputs non-negative integers <= 255 (bf16-exact), so the
    # selector matmul below is exact at default precision and the bit shift can be
    # folded into the selector weights.
    q = q - jnp.float32(256.0) * jnp.floor(q * jnp.float32(1.0 / 256.0))

    # Lane expansion + per-bit scaling in one matmul against the resident selector:
    #   qe[:, k*B + j] = q[:, k] * 2**(j - (B - 1))
    # Exactly one nonzero term per output lane; every factor is bf16-exact => exact.
    qe = jnp.dot(q, sel_ref[...], preferred_element_type=jnp.float32)  # (tb, nb)

    # bit (B-1-j) of the wrapped value: floor(qe) & 1 (qe >= 0 so the int32
    # truncation is the floor).
    bits = jnp.bitwise_and(qe.astype(jnp.int32), jnp.int32(1))
    out_ref[...] = bits.astype(out_ref.dtype)


# --------------------------------------------------------------------------- #
# Host-side helpers
# --------------------------------------------------------------------------- #
def _fold_factor(batch, n):
    """Fold f rows into the lane axis (f*n lanes per folded row) for lane density."""
    if n >= 128:
        return 1
    f = max(1, 128 // n)
    while f > 1 and batch % f:
        f -= 1
    return f


def _make_selector(nf, B):
    """(nf, nf*B) f32 one-hot lane-expansion matrix with 2**-(B-1-j) folded in."""
    k = np.arange(nf)[:, None]
    m = np.arange(nf * B)[None, :]
    onehot = (m // B == k).astype(np.float64)
    scale = np.exp2(-((B - 1) - (m % B)).astype(np.float64))
    return jnp.asarray((onehot * scale).astype(np.float32))


def _tpu_params():
    """(VMEM tile budget bytes, TensorCores to shard the row axis over).

    Budgets stay below each generation's *default* scoped-VMEM limit
    (v5e 16 MiB, v6e/v7x 32 MiB), so no vmem_limit_bytes override is needed.
    """
    kind = ""
    try:
        kind = jax.devices()[0].device_kind.lower()
    except Exception:
        pass
    if "v7" in kind or "7x" in kind:
        return 16 << 20, 2      # 2 TCs/chip, 64 MiB physical VMEM: balanced 2-way split
    if "v5" in kind and ("lite" in kind or "v5e" in kind):
        return 12 << 20, 1      # single TC, 16 MiB default scoped: one big tile, no split
    return 24 << 20, 1          # v6e / v5p / v4: single-TC grid, biggest tile


def _choose_row_tile(rows, nf, B, out_itemsize, budget, num_cores):
    """Largest VMEM-fitting row tile, aligned to the output dtype's sublane packing."""
    nb = nf * B
    # Per-row footprint: double-buffered pipelined input/output + live in-kernel
    # intermediates (q chain on the narrow side; qe f32 / int32 bits / cast on the
    # wide side).  Counting intermediates keeps us under the scoped-VMEM limit.
    bytes_per_row = (2 * (4 * nf + out_itemsize * nb)
                     + 3 * 4 * nf
                     + 3 * 4 * nb)
    align = 8 * max(1, 4 // out_itemsize)        # 8 rows f32, 16 bf16, 32 int8
    tb = max(align, budget // bytes_per_row)
    tb = min(tb, 8192)                           # diminishing returns past this
    if num_cores > 1 and rows > align:
        # Balanced split across TensorCores (megacore) so no core idles on a tail.
        per_core = -(-rows // num_cores)
        per_core = -(-per_core // align) * align
        tb = min(tb, per_core)
    if tb >= rows:
        return rows                              # whole batch in one block: grid=(1,)
    return max(align, (tb // align) * align)


# --------------------------------------------------------------------------- #
# Public wrapper: QuantizationLayer.forward
# --------------------------------------------------------------------------- #
def quantization_layer(x, B, *, out_dtype=jnp.float32, row_tile=None):
    """(batch, n) f32 -> (batch, n*B) bits (MSB first per group) in `out_dtype`."""
    batch, n = x.shape
    fold = _fold_factor(batch, n)
    rows, nf = batch // fold, n * fold
    nb = nf * B

    x_f = x.reshape(rows, nf)                    # free row-major view
    sel = _make_selector(nf, B)

    out_itemsize = jnp.dtype(out_dtype).itemsize
    budget, num_cores = _tpu_params()
    if row_tile is not None:                     # explicit override (used by tests)
        align = 8 * max(1, 4 // out_itemsize)
        tb = min(rows, max(align, (int(row_tile) // align) * align))
    else:
        tb = _choose_row_tile(rows, nf, B, out_itemsize, budget, num_cores)

    grid = (pl.cdiv(rows, tb),)
    out_f = pl.pallas_call(
        functools.partial(_quantization_kernel, B=B),
        out_shape=jax.ShapeDtypeStruct((rows, nb), out_dtype),
        grid=grid,
        in_specs=[
            pl.BlockSpec((tb, nf), lambda b: (b, 0)),      # row tile of the input
            pl.BlockSpec((nf, nb), lambda b: (0, 0)),      # resident selector
        ],
        out_specs=pl.BlockSpec((tb, nb), lambda b: (b, 0)),
        compiler_params=pltpu.CompilerParams(
            dimension_semantics=("parallel",)),
    )(x_f, sel)
    return out_f.reshape(batch, n * B)           # free row-major view


# --------------------------------------------------------------------------- #
# Reference + self-test
# --------------------------------------------------------------------------- #
def _reference(x, B):
    """Pure numpy reference mirroring the PyTorch Quantization.apply + Num2Bit path."""
    x = np.asarray(x, dtype=np.float32)
    step = np.float32(2 ** B)
    q = np.round(x * step - np.float32(0.5))     # numpy round is half-to-even too
    q = q.astype(np.int64) & 0xFF                # torch uint8 cast (wrap)
    batch, n = x.shape
    out = np.zeros((batch, n, B), dtype=np.float32)
    for j in range(B):
        out[:, :, j] = (q >> (B - 1 - j)) & 1
    return out.reshape(batch, n * B)


if __name__ == "__main__":
    B = 4
    n = 32                                       # feedback_bits = 128 -> quantizer input width
    k0, k1, k2 = jax.random.split(jax.random.PRNGKey(0), 3)

    # 1) Tiny batch (module-consistent shape), single block grid=(1,), f32 bits.
    x1 = jax.random.uniform(k0, (2, n), dtype=jnp.float32)
    o1 = jax.block_until_ready(quantization_layer(x1, B))
    assert o1.shape == (2, n * B), o1.shape
    assert o1.dtype == jnp.float32, o1.dtype
    np.testing.assert_array_equal(np.asarray(o1), _reference(np.asarray(x1), B))

    # 2) Multi-tile path: force 8-row tiles so the grid has a partial last block.
    x2 = jax.random.uniform(k1, (50, n), dtype=jnp.float32)
    o2 = jax.block_until_ready(quantization_layer(x2, B, row_tile=8))
    np.testing.assert_array_equal(np.asarray(o2), _reference(np.asarray(x2), B))

    # 3) Reduced-HBM-write variant: bf16 bit output (0.0/1.0 are exact in bf16).
    x3 = jax.random.uniform(k2, (48, n), dtype=jnp.float32)
    o3 = jax.block_until_ready(quantization_layer(x3, B, out_dtype=jnp.bfloat16))
    assert o3.dtype == jnp.bfloat16, o3.dtype
    np.testing.assert_array_equal(np.asarray(o3).astype(np.float32),
                                  _reference(np.asarray(x3), B))

    print("KERNEL_OK")
</pallas_src>

<mosaic_0001>
module attributes {stable_mosaic.version = 11 : i64} {
  func.func @_quantization_kernel(%arg0: i32, %arg1: memref<1x64xf32, #tpu.memory_space<vmem>>, %arg2: memref<64x256xf32, #tpu.memory_space<vmem>>, %arg3: memref<1x256xf32, #tpu.memory_space<vmem>>) attributes {dimension_semantics = [#tpu.dimension_semantics<parallel>], iteration_bounds = array<i64: 1>, scalar_prefetch = 0 : i64, scratch_operands = 0 : i64, tpu.core_type = #tpu.core_type<tc>, window_params = [{transform_indices = @transform_0, window_bounds = array<i64: 1, 64>}, {pipeline_mode = #tpu.pipeline_mode<synchronous>, transform_indices = @transform_1, window_bounds = array<i64: 64, 256>}, {transform_indices = @transform_2, window_bounds = array<i64: 1, 256>}]} {
    %c0 = arith.constant 0 : index
    %c0_0 = arith.constant 0 : index
    %0 = vector.load %arg1[%c0, %c0_0] : memref<1x64xf32, #tpu.memory_space<vmem>>, vector<1x64xf32>
    %cst = arith.constant 1.600000e+01 : f32
    %1 = vector.broadcast %cst : f32 to vector<1x64xf32>
    %2 = arith.mulf %0, %1 : vector<1x64xf32>
    %cst_1 = arith.constant 5.000000e-01 : f32
    %3 = vector.broadcast %cst_1 : f32 to vector<1x64xf32>
    %4 = arith.subf %2, %3 : vector<1x64xf32>
    %5 = math.roundeven %4 : vector<1x64xf32>
    %cst_2 = arith.constant 3.906250e-03 : f32
    %6 = vector.broadcast %cst_2 : f32 to vector<1x64xf32>
    %7 = arith.mulf %5, %6 : vector<1x64xf32>
    %8 = math.floor %7 : vector<1x64xf32>
    %cst_3 = arith.constant 2.560000e+02 : f32
    %9 = vector.broadcast %cst_3 : f32 to vector<1x64xf32>
    %10 = arith.mulf %9, %8 : vector<1x64xf32>
    %11 = arith.subf %5, %10 : vector<1x64xf32>
    %c0_4 = arith.constant 0 : index
    %c0_5 = arith.constant 0 : index
    %12 = vector.load %arg2[%c0_4, %c0_5] : memref<64x256xf32, #tpu.memory_space<vmem>>, vector<64x256xf32>
    %cst_6 = arith.constant dense<0.000000e+00> : vector<1x256xf32>
    %13 = tpu.matmul %11, %12, %cst_6 {dimension_numbers = #tpu.dot_dimension_numbers<[1], [0], [0], [1], [0, 0, 1, 1], [], []>} : vector<1x64xf32>, vector<64x256xf32>, vector<1x256xf32> -> vector<1x256xf32>
    %14 = arith.fptosi %13 : vector<1x256xf32> to vector<1x256xi32>
    %c1_i32 = arith.constant 1 : i32
    %15 = vector.broadcast %c1_i32 : i32 to vector<1x256xi32>
    %16 = arith.andi %14, %15 : vector<1x256xi32>
    %17 = arith.sitofp %16 : vector<1x256xi32> to vector<1x256xf32>
    %c0_7 = arith.constant 0 : index
    %c0_8 = arith.constant 0 : index
    %18 = vector.load %arg3[%c0_7, %c0_8] : memref<1x256xf32, #tpu.memory_space<vmem>>, vector<1x256xf32>
    tpu.vector_store %arg3[%c0_7, %c0_8], %17 {strides = array<i32>} : memref<1x256xf32, #tpu.memory_space<vmem>>, vector<1x256xf32>,
    return
  }
  func.func @transform_0(%arg0: i32) -> (i32, i32) {
    %c0_i32 = arith.constant 0 : i32
    %c0_i32_0 = arith.constant 0 : i32
    return %arg0, %c0_i32 : i32, i32
  }
  func.func @transform_1(%arg0: i32) -> (i32, i32) {
    %c0_i32 = arith.constant 0 : i32
    %c0_i32_0 = arith.constant 0 : i32
    %c0_i32_1 = arith.constant 0 : i32
    return %c0_i32, %c0_i32_0 : i32, i32
  }
  func.func @transform_2(%arg0: i32) -> (i32, i32) {
    %c0_i32 = arith.constant 0 : i32
    %c0_i32_0 = arith.constant 0 : i32
    return %arg0, %c0_i32 : i32, i32
  }
}

</mosaic_0001>

<bundles_post_ra>
// kernel: tpu_custom_call.1
= control target key start
LH: loop header
LB: loop body
LE: loop exit
PB: predicated region body
PF: predicated region fallthrough
CT: control target
= control target key end

     0   :  { %7 = vsyncpa [#allocation3], 0  ;;  %s300_s0 = inlined_call_operand.hbm [shape: f32[1,64], index: 0, kind: input, shape index: {}]   ;;  %s301_s1 = inlined_call_operand.hbm [shape: f32[64,256], index: 1, kind: input, shape index: {}]   ;;  %s302_s2 = inlined_call_operand.hbm [shape: f32[1,256], index: 2, kind: output, shape index: {}]  }
   0x1   :  { %8 = vsyncpa [#allocation6], 0 }
   0x2   :  { %9 = vsyncpa [#allocation4], 0  ;;  %s269_s9 = smov [#allocation2]   ;;  %s270_s11 = smov [#allocation5]  }
   0x3   :  { %s16_s10 = sshll.u32 %s269_s9, 4  ;;  %s25_s12 = sshll.u32 %s270_s11, 4  ;;  %s17_s10 = int_to_ptr.vmem [resolvable:$true] %s16_s10  ;;  %s26_s12 = int_to_ptr.vmem [resolvable:$true] %s25_s12 }
   0x4   :  { %s211_s13 = scalar_lea.vmem %s17_s10, 16  ;;  %s215_s14 = scalar_lea.vmem %s17_s10, 32 }
   0x5   :  { %p212_p0 = scmp.ne.s32.totalorder %s17_s10, %s211_s13  ;;  %p216_p1 = scmp.lt.s32.totalorder %s17_s10, %s17_s10 }
   0x6   :  { %p217_p2 = scmp.lt.s32.totalorder %s215_s14, %s211_s13 }
   0x8   :  { %p218_p3 = por %p217_p2, %p216_p1 }
   0xa   :  { %p219_p4 = pnand %p218_p3, %p212_p0 }
   0xc   :  { %222 = shalt.err (!%p219_p4)
}
   0xd   :  { %19 = dma.hbm_to_vmem [thread:$0]  %s300_s0, 16, %s17_s10, [#allocation3]  }
   0xe   :  { %s231_s17 = scalar_lea.vmem %s26_s12, 2048  ;;  %p236_p6 = scmp.lt.s32.totalorder %s26_s12, %s26_s12 }
   0xf   :  { %p232_p5 = scmp.ne.s32.totalorder %s26_s12, %s231_s17  ;;  %p237_p7 = scmp.lt.s32.totalorder %s231_s17, %s231_s17 }
  0x11   :  { %p238_p8 = por %p237_p7, %p236_p6 }
  0x13   :  { %p239_p9 = pnand %p238_p8, %p232_p5 }
  0x15   :  { %242 = shalt.err (!%p239_p9)
}
  0x16   :  { %s271_s18 = smov 256   ;;  %s272_s19 = smov 16  }
  0x17   :  { %31 = dma.hbm_to_vmem [thread:$0]  %s301_s1, 2048, %s26_s12, [#allocation6], %s271_s18, %s271_s18, %s272_s19  }
  0x18   :  { %263 = dma.done.wait [#allocation3], 16  }
  0x19   :  { %264 = vsyncadd [#allocation3], 4294967280 }
  0x1a   :  { %265 = dma.done.wait [#allocation6], 2048  }
  0x1b   :  { %266 = vsyncadd [#allocation6], 4294965248  ;;  %v273_v0 = vmov 0.0   ;;  %v61_v1 = vld [vmem:[#allocation5 + $0x78] sm:$0xff]  ;;  %v60_v2 = vld [vmem:[#allocation5 + $0x70] sm:$0xff]  ;;  %vm62_vm1 = vcmask 523264   ;;  %v149_v35 = vlaneseq }
  0x1c   :  { %130 = vmatprep.mubr.f32.mxu0 %v273_v0  ;;  %v59_v3 = vld [vmem:[#allocation5 + $0x68] sm:$0xff]  ;;  %82 = vmatprep.subr.mxu0 %v61_v1  ;;  %v58_v4 = vld [vmem:[#allocation5 + $0x60] sm:$0xff]  ;;  %v57_v5 = vld [vmem:[#allocation5 + $0x58] sm:$0xff]  ;;  %v274_v33 = vmov 1966171168   ;;  %s275_s0 = smov [#allocation7]  }
  0x1d   :  { %83 = vmatpush1.msra.mxu0 %v60_v2  ;;  %v56_v6 = vld [vmem:[#allocation5 + $0x50] sm:$0xff]  ;;  %v55_v7 = vld [vmem:[#allocation5 + $0x48] sm:$0xff]  ;;  %v54_v8 = vld [vmem:[#allocation5 + $0x40] sm:$0xff]  ;;  %v147_v34 = vunpack.c.l.s4 %v274_v33  ;;  %v150_v42 = vshrl.u32 %v149_v35, 7  ;;  %s172_s1 = sshll.u32 %s275_s0, 4  ;;  %vm163_vm2 = vcmp.lt.s32.totalorder %v149_v35, 256  ;;  %s173_s1 = int_to_ptr.vmem [resolvable:$true] %s172_s1 }
  0x1e   :  { %84 = vmatprep.subr.mxu0 %v59_v3  ;;  %v38_v9 = vld [vmem:[#allocation2] sm:$0x1]  ;;  %v52_v12 = vld [vmem:[#allocation5 + $0x30] sm:$0xff]  ;;  %v51_v13 = vld [vmem:[#allocation5 + $0x28] sm:$0xff]  ;;  %s243_s22 = scalar_lea.vmem %s173_s1, 32  ;;  %p248_p11 = scmp.lt.s32.totalorder %s173_s1, %s173_s1 }
  0x1f   :  { %85 = vmatpush1.msra.mxu0 %v58_v4  ;;  %v53_v10 = vld [vmem:[#allocation5 + $0x38] sm:$0xff]  ;;  %v39_v11 = vmul.f32 16.0, %v38_v9  ;;  %v50_v15 = vld [vmem:[#allocation5 + $0x20] sm:$0xff]  ;;  %v48_v18 = vld [vmem:[#allocation5 + $0x10] sm:$0xff]  ;;  %v148_v41 = vunpack.c.0.s8 %v147_v34  ;;  %p244_p10 = scmp.ne.s32.totalorder %s173_s1, %s243_s22  ;;  %p249_p12 = scmp.lt.s32.totalorder %s243_s22, %s243_s22 }
  0x20   :  { %86 = vmatprep.subr.mxu0 %v57_v5  ;;  %v49_v16 = vld [vmem:[#allocation5 + $0x18] sm:$0xff]  ;;  %v47_v20 = vld [vmem:[#allocation5 + $0x8] sm:$0xff]  ;;  %v46_v23 = vld [vmem:[#allocation5] sm:$0xff] }
  0x21   :  { %87 = vmatpush1.msra.mxu0 %v56_v6  ;;  %v182_v14 = vadd.f32 -0.5, %v39_v11  ;;  %v151_v46 = vsub.s32 %v148_v41, %v150_v42  ;;  %p250_p13 = por %p249_p12, %p248_p11 }
  0x22   :  { %88 = vmatprep.subr.mxu0 %v55_v7 }
  0x23   :  { %89 = vmatpush1.msra.mxu0 %v54_v8  ;;  %v186_v17 = vcvt.f32.s32 %v182_v14  ;;  %v184_v19 = vand.u32 2147483647, %v182_v14  ;;  %v189_v22 = vand.u32 2147483648, %v182_v14  ;;  %p251_p0 = pnand %p250_p13, %p244_p10 }
  0x24   :  { %90 = vmatprep.subr.mxu0 %v53_v10 }
  0x25   :  { %91 = vmatpush1.msra.mxu0 %v52_v12  ;;  %v187_v21 = vcvt.s32.f32 %v186_v17  ;;  %vm185_vm0 = vcmp.lt.f32.partialorder %v184_v19, 8388608.0 }
  0x26   :  { %92 = vmatprep.subr.mxu0 %v51_v13 }
  0x27   :  { %93 = vmatpush1.msra.mxu0 %v50_v15  ;;  %v188_v24 = vand.u32 2147483647, %v187_v21 }
  0x28   :  { %94 = vmatprep.subr.mxu0 %v49_v16 }
  0x29   :  { %95 = vmatpush1.msra.mxu0 %v48_v18  ;;  %v190_v25 = vor.u32 %v189_v22, %v188_v24 }
  0x2a   :  { %96 = vmatprep.subr.mxu0 %v47_v20 }
  0x2b   :  { %97 = vmatpush1.msra.mxu0 %v46_v23  ;;  %v191_v26 = vsel %vm185_vm0, %v190_v25, %v182_v14 }
  0x2c   :  { %v42_v27 = vmul.f32 0.00390625, %v191_v26 }
  0x2e   :  { %v43_v28 = vfloor.f32 %v42_v27 }
  0x30   :  { %v44_v29 = vmul.f32 256.0, %v43_v28 }
  0x32   :  { %v45_v30 = vsub.f32 %v191_v26, %v44_v29 }
  0x34   :  { %183 = vmatmul.mubr.msk.f32.vlgmr.msra.gmra.mxu0 %vm62_vm1, %v45_v30 }
  0xf4   :  { %v132_v31 = vpop.f32.mrf.mxu0 }
  0xf5   :  { %v192_v32 = vtrunc.f32 %v132_v31 }
  0xf6   :  { %v134_v36 = vpop.f32.mrf.mxu0 }
  0xf7   :  { %v193_v37 = vcvt.f32.s32 %v192_v32  ;;  %v194_v38 = vtrunc.f32 %v134_v36 }
  0xf9   :  { %v139_v39 = vand.u32 1, %v193_v37  ;;  %v195_v40 = vcvt.f32.s32 %v194_v38 }
  0xfb   :  { %v140_v43 = vand.u32 1, %v195_v40  ;;  %v141_v44 = vcvt.s32.f32 %v139_v39 }
  0xfd   :  { %v142_v45 = vcvt.s32.f32 %v140_v43 }
  0xff   :  { %v145_v47 = vcombine.low %v141_v44, %v142_v45 }
 0x101   :  { %v152_v48 = vrot.slane %v145_v47, %v151_v46 }
 0x103   :  { %v159_v49 = vrot.slane %v152_v48, %v151_v46 }
 0x105   :  { %165 = vst.msk [vmem:[#allocation7] sm:$0x3] %vm163_vm2, %v159_v49 }
 0x106   :  { %254 = shalt.err (!%p251_p0)
}
 0x107   :  { %175 = dma.vmem_to_hbm [thread:$0]  %s173_s1, 32, %s302_s2, [#allocation4]  }
 0x108   :  { %267 = dma.done.wait [#allocation4], 32  }
 0x109   :  { %268 = vsyncadd [#allocation4], 4294967264 }
 0x10a   :  { %179 = vsyncpa [#allocation3], 1 }
 0x10b   :  { %180 = vsyncpa [#allocation6], 1 }
 0x10c   :  { %181 = vsyncpa [#allocation4], 1 }

</bundles_post_ra>
